<compile_context>
chip_gen: v7x
topology: tpu7x:2x2x1
jax: 0.10.0
libtpu: 0.0.40
codegen_flags: <defaults>
</compile_context>

<pallas_src>
import numpy as np
import jax
import jax.numpy as jnp
from jax.experimental import pallas as pl
from jax.experimental.pallas import tpu as pltpu

# ----------------- configuration (mirrors TTN_VQC.__init__) -----------------
IN_MODES  = (7, 16, 7)        # TTLinear input modes  -> input_dims = 784
OUT_MODES = (2, 2, 2)         # TTLinear output modes -> pre_out dim = 8
TT_RANKS  = (1, 3, 3, 1)
N_QUBITS  = 8                 # = prod(OUT_MODES): VQC width
Q_DEPTH   = 6
FEAT_DIMS = 4                 # args.feat_dims (post_net output features)
BATCH     = 2

INPUT_DIM = int(np.prod(IN_MODES))    # 784
PRE_DIM   = int(np.prod(OUT_MODES))   # 8
STATE_DIM = 2 ** N_QUBITS             # 256
OUT_PAD   = 128                       # lane-dense output width (sliced to FEAT_DIMS)


# ----------------------- circuit-unitary construction -----------------------
def _rx(theta):
    c, s = np.cos(theta / 2.0), np.sin(theta / 2.0)
    return np.array([[c, -1j * s], [-1j * s, c]], dtype=np.complex128)


def _ry(theta):
    c, s = np.cos(theta / 2.0), np.sin(theta / 2.0)
    return np.array([[c, -s], [s, c]], dtype=np.complex128)


def _rz(theta):
    return np.array([[np.exp(-1j * theta / 2.0), 0.0],
                     [0.0, np.exp(1j * theta / 2.0)]], dtype=np.complex128)


def _single(gate, wire, n):
    full = np.array([[1.0 + 0j]])
    for w in range(n):
        full = np.kron(full, gate if w == wire else np.eye(2, dtype=np.complex128))
    return full


def _cnot(control, target, n):
    dim = 2 ** n
    m = np.zeros((dim, dim), dtype=np.complex128)
    for k in range(dim):
        if (k >> (n - 1 - control)) & 1:
            m[k ^ (1 << (n - 1 - target)), k] = 1.0
        else:
            m[k, k] = 1.0
    return m


def build_circuit_unitary(q_params, q_depth, n):
    """Unitary of the VQC *after* the data-dependent RY encoding layer."""
    qw = np.asarray(q_params, dtype=np.float64).reshape(3, q_depth, n)
    dim = 2 ** n
    U = np.eye(dim, dtype=np.complex128)
    for k in range(q_depth):
        for qb in range(n):                       # Entangle_Layer (CNOT ring)
            U = _cnot(qb, (qb + 1) % n, n) @ U
        for qb in range(n):                       # RX_Layer
            U = _single(_rx(qw[0, k, qb]), qb, n) @ U
        for qb in range(n):                       # RY_Layer
            U = _single(_ry(qw[1, k, qb]), qb, n) @ U
        for qb in range(n):                       # RZ_Layer
            U = _single(_rz(qw[2, k, qb]), qb, n) @ U
    return U


def build_zsign(n):
    """zsign[k, j] = <k| Z_j |k> = +1 / -1 (wire 0 = most-significant bit)."""
    dim = 2 ** n
    k = np.arange(dim)[:, None]
    j = np.arange(n)[None, :]
    bits = (k >> (n - 1 - j)) & 1
    return (1.0 - 2.0 * bits).astype(np.float32)


# ------------------------------- Pallas kernel -------------------------------
def ttn_vqc_kernel(x_ref, wtt_ref, btt_ref, utre_ref, utim_ref, sgn_ref,
                   m_ref, bp_ref, out_ref):
    # --- TTLinear as effective dense matmul (bf16 operands, f32 accumulate) ---
    pre = jnp.dot(x_ref[...], wtt_ref[...],
                  preferred_element_type=jnp.float32) + btt_ref[...]  # [tb, 8]

    # --- angle encoding: q_in = pre * pi/2, half-angles for RY amplitudes ---
    half = pre * (np.pi / 4.0)
    c = jnp.cos(half)                                                 # [tb, 8]
    s = jnp.sin(half)

    # --- RY product state: one select per qubit via the +/-1 sign table ---
    # amp_j(k) = cos(half_j) if bit_j(k)==0 (sign>0) else sin(half_j)
    sgn = sgn_ref[...]                                                # [8, 256]
    psi0 = jnp.where(sgn[0:1, :] > 0.0, c[:, 0:1], s[:, 0:1])         # [tb, 256]
    for j in range(1, N_QUBITS):
        psi0 = psi0 * jnp.where(sgn[j:j + 1, :] > 0.0, c[:, j:j + 1], s[:, j:j + 1])
    psi0_bf = psi0.astype(jnp.bfloat16)

    # --- circuit unitary: split Re/Im [256,256] GEMMs, incremental probs ---
    psi_re = jnp.dot(psi0_bf, utre_ref[...],
                     preferred_element_type=jnp.float32)              # [tb, 256]
    probs = psi_re * psi_re
    psi_im = jnp.dot(psi0_bf, utim_ref[...],
                     preferred_element_type=jnp.float32)              # [tb, 256]
    probs = probs + psi_im * psi_im                                   # [tb, 256]

    # --- fused PauliZ readout + post_net: M = zsign @ Wp^T (bf16, lane-padded) ---
    out = jnp.dot(probs.astype(jnp.bfloat16), m_ref[...],
                  preferred_element_type=jnp.float32) + bp_ref[...]   # [tb, 128]
    out_ref[...] = out.astype(jnp.bfloat16)


def _round_up(a, b):
    return (a + b - 1) // b * b


def _choose_tile(B, batch_tile):
    """Batch tile: >=8-row path for tiny batches; 128-multiples otherwise,
    capped so the grid has >=2 steps when possible (v7x two-core sharding)."""
    if B < 128:
        return _round_up(max(B, 8), 8)
    b128 = _round_up(B, 128)
    tb = _round_up(min(batch_tile, b128), 128)
    if b128 >= 256 and b128 // tb < 2:
        tb = _round_up(b128 // 2, 128)
    return tb


def ttn_vqc_forward(x, W_tt_bf, b_tt, ut_re_bf, ut_im_bf, signT, M_pad_bf, bp_pad,
                    *, batch_tile=512):
    """x: [B, 784] f32 -> [B, FEAT_DIMS] f32."""
    B = x.shape[0]
    tb = _choose_tile(B, batch_tile)
    B_pad = _round_up(B, tb)

    # bf16 x stream from HBM (halves the dominant DMA; rounding identical to
    # the previous in-kernel cast).
    x = x.astype(jnp.bfloat16)
    if B_pad != B:
        x = jnp.pad(x, ((0, B_pad - B), (0, 0)))

    args = (x, W_tt_bf, b_tt, ut_re_bf, ut_im_bf, signT, M_pad_bf, bp_pad)
    in_specs = [
        pl.BlockSpec((tb, INPUT_DIM), lambda i: (i, 0)),          # x: tiled on batch
        pl.BlockSpec(W_tt_bf.shape,   lambda i: (0, 0)),          # weights: resident
        pl.BlockSpec(b_tt.shape,      lambda i: (0, 0)),
        pl.BlockSpec(ut_re_bf.shape,  lambda i: (0, 0)),
        pl.BlockSpec(ut_im_bf.shape,  lambda i: (0, 0)),
        pl.BlockSpec(signT.shape,     lambda i: (0, 0)),
        pl.BlockSpec(M_pad_bf.shape,  lambda i: (0, 0)),
        pl.BlockSpec(bp_pad.shape,    lambda i: (0, 0)),
    ]

    flops = B_pad * (2 * INPUT_DIM * PRE_DIM
                     + 2 * 2 * STATE_DIM * STATE_DIM
                     + 2 * STATE_DIM * OUT_PAD)
    weight_bytes = sum(int(np.prod(a.shape)) * a.dtype.itemsize for a in args[1:])
    bytes_accessed = (weight_bytes                      # resident weights, counted once
                      + B_pad * INPUT_DIM * 2           # bf16 x
                      + B_pad * OUT_PAD * 2)            # bf16 out
    cost = pl.CostEstimate(flops=flops,
                           transcendentals=2 * B_pad * N_QUBITS,
                           bytes_accessed=bytes_accessed)

    out = pl.pallas_call(
        ttn_vqc_kernel,
        out_shape=jax.ShapeDtypeStruct((B_pad, OUT_PAD), jnp.bfloat16),
        grid=(B_pad // tb,),
        in_specs=in_specs,
        out_specs=pl.BlockSpec((tb, OUT_PAD), lambda i: (i, 0)),
        compiler_params=pltpu.CompilerParams(
            dimension_semantics=("parallel",),
            vmem_limit_bytes=32 * 1024 * 1024),
        cost_estimate=cost,
    )(*args)
    return out[:B, :FEAT_DIMS].astype(jnp.float32)


# ------------------------------ pure-JAX reference ---------------------------
def reference_forward(x, W_tt, b_tt, U, zsign, Wp, bp):
    pre = x @ W_tt + b_tt
    q_in = pre * (np.pi / 2.0)
    c = jnp.cos(q_in / 2.0)
    s = jnp.sin(q_in / 2.0)
    psi0 = jnp.ones((x.shape[0], 1), jnp.float32)
    for j in range(N_QUBITS):
        amp = jnp.stack([c[:, j], s[:, j]], axis=-1)                 # [B, 2]
        psi0 = (psi0[:, :, None] * amp[:, None, :]).reshape(x.shape[0], -1)
    psi = psi0.astype(jnp.complex64) @ jnp.asarray(U, dtype=jnp.complex64).T
    probs = jnp.abs(psi) ** 2
    q_out = probs @ zsign
    return q_out @ Wp.T + bp


# ------------------------------------ main ------------------------------------
if __name__ == "__main__":
    key = jax.random.PRNGKey(0)
    k_c0, k_c1, k_c2, k_btt, k_q, k_wp, k_bp, k_x, k_x2 = jax.random.split(key, 9)

    # TT cores (deterministic synthetic init), contracted to effective [784, 8].
    core0 = 0.1 * jax.random.normal(k_c0, (TT_RANKS[0], IN_MODES[0], OUT_MODES[0], TT_RANKS[1]), jnp.float32)
    core1 = 0.1 * jax.random.normal(k_c1, (TT_RANKS[1], IN_MODES[1], OUT_MODES[1], TT_RANKS[2]), jnp.float32)
    core2 = 0.1 * jax.random.normal(k_c2, (TT_RANKS[2], IN_MODES[2], OUT_MODES[2], TT_RANKS[3]), jnp.float32)
    W_tt = jnp.einsum('aipb,bjqc,ckrd->ijkpqr', core0, core1, core2).reshape(INPUT_DIM, PRE_DIM)
    b_tt = 0.01 * jax.random.normal(k_btt, (PRE_DIM,), jnp.float32)

    # VQC parameters: 0.01 * randn(q_depth * n_qubits * 3)
    q_params = 0.01 * jax.random.normal(k_q, (Q_DEPTH * N_QUBITS * 3,), jnp.float32)

    # post_net: nn.Linear(n_qubits, feat_dims)
    Wp = 0.1 * jax.random.normal(k_wp, (FEAT_DIMS, N_QUBITS), jnp.float32)
    bp = 0.01 * jax.random.normal(k_bp, (FEAT_DIMS,), jnp.float32)

    # --- parameter glue (numpy/JAX, done once per parameter update) ---
    U = build_circuit_unitary(np.asarray(q_params), Q_DEPTH, N_QUBITS)     # [256, 256] complex
    UT = U.T
    ut_re_bf = jnp.asarray(np.ascontiguousarray(UT.real), jnp.bfloat16)    # [256, 256]
    ut_im_bf = jnp.asarray(np.ascontiguousarray(UT.imag), jnp.bfloat16)    # [256, 256]
    zsign_np = build_zsign(N_QUBITS)                                       # [256, 8]
    zsign = jnp.asarray(zsign_np)
    signT = jnp.asarray(zsign_np.T)                                        # [8, 256] (+1/-1)
    # Fused PauliZ readout + post_net weight, lane-padded to 128 columns (pad = 0).
    M = zsign_np @ np.asarray(Wp).T                                        # [256, 4]
    M_pad_bf = jnp.asarray(np.pad(M, ((0, 0), (0, OUT_PAD - FEAT_DIMS))), jnp.bfloat16)
    bp_pad = jnp.asarray(
        np.pad(np.asarray(bp).reshape(1, FEAT_DIMS),
               ((0, 0), (0, OUT_PAD - FEAT_DIMS))), jnp.float32)
    W_tt_bf = W_tt.astype(jnp.bfloat16)
    b_tt2d = b_tt.reshape(1, PRE_DIM)

    # --- small test batch (spec: B=2) ---
    x = jax.random.normal(k_x, (BATCH, INPUT_DIM), jnp.float32)
    out = jax.block_until_ready(
        ttn_vqc_forward(x, W_tt_bf, b_tt2d, ut_re_bf, ut_im_bf, signT, M_pad_bf, bp_pad))
    ref = jax.block_until_ready(reference_forward(x, W_tt, b_tt, U, zsign, Wp, bp))
    assert out.shape == (BATCH, FEAT_DIMS)
    np.testing.assert_allclose(np.asarray(out), np.asarray(ref), rtol=1e-2, atol=1e-2)

    # --- larger batch: exercises padding + a 2-step parallel grid (megacore) ---
    B2 = 200
    x2 = jax.random.normal(k_x2, (B2, INPUT_DIM), jnp.float32)
    out2 = jax.block_until_ready(
        ttn_vqc_forward(x2, W_tt_bf, b_tt2d, ut_re_bf, ut_im_bf, signT, M_pad_bf, bp_pad))
    ref2 = jax.block_until_ready(reference_forward(x2, W_tt, b_tt, U, zsign, Wp, bp))
    assert out2.shape == (B2, FEAT_DIMS)
    np.testing.assert_allclose(np.asarray(out2), np.asarray(ref2), rtol=1e-2, atol=1e-2)

    print("KERNEL_OK")
</pallas_src>

<mosaic_0001>
module attributes {stable_mosaic.version = 11 : i64} {
  func.func @ttn_vqc_kernel(%arg0: i32, %arg1: memref<8x784xbf16, #tpu.memory_space<vmem>>, %arg2: memref<784x8xbf16, #tpu.memory_space<vmem>>, %arg3: memref<1x8xf32, #tpu.memory_space<vmem>>, %arg4: memref<256x256xbf16, #tpu.memory_space<vmem>>, %arg5: memref<256x256xbf16, #tpu.memory_space<vmem>>, %arg6: memref<8x256xf32, #tpu.memory_space<vmem>>, %arg7: memref<256x128xbf16, #tpu.memory_space<vmem>>, %arg8: memref<1x128xf32, #tpu.memory_space<vmem>>, %arg9: memref<8x128xbf16, #tpu.memory_space<vmem>>) attributes {dimension_semantics = [#tpu.dimension_semantics<parallel>], iteration_bounds = array<i64: 1>, scalar_prefetch = 0 : i64, scratch_operands = 0 : i64, tpu.core_type = #tpu.core_type<tc>, window_params = [{transform_indices = @transform_0, window_bounds = array<i64: 8, 784>}, {pipeline_mode = #tpu.pipeline_mode<synchronous>, transform_indices = @transform_1, window_bounds = array<i64: 784, 8>}, {pipeline_mode = #tpu.pipeline_mode<synchronous>, transform_indices = @transform_2, window_bounds = array<i64: 1, 8>}, {pipeline_mode = #tpu.pipeline_mode<synchronous>, transform_indices = @transform_3, window_bounds = array<i64: 256, 256>}, {pipeline_mode = #tpu.pipeline_mode<synchronous>, transform_indices = @transform_4, window_bounds = array<i64: 256, 256>}, {pipeline_mode = #tpu.pipeline_mode<synchronous>, transform_indices = @transform_5, window_bounds = array<i64: 8, 256>}, {pipeline_mode = #tpu.pipeline_mode<synchronous>, transform_indices = @transform_6, window_bounds = array<i64: 256, 128>}, {pipeline_mode = #tpu.pipeline_mode<synchronous>, transform_indices = @transform_7, window_bounds = array<i64: 1, 128>}, {transform_indices = @transform_8, window_bounds = array<i64: 8, 128>}]} {
    %c0 = arith.constant 0 : index
    %c0_0 = arith.constant 0 : index
    %0 = vector.load %arg1[%c0, %c0_0] : memref<8x784xbf16, #tpu.memory_space<vmem>>, vector<8x784xbf16>
    %c0_1 = arith.constant 0 : index
    %c0_2 = arith.constant 0 : index
    %1 = vector.load %arg2[%c0_1, %c0_2] : memref<784x8xbf16, #tpu.memory_space<vmem>>, vector<784x8xbf16>
    %cst = arith.constant dense<0.000000e+00> : vector<8x8xf32>
    %2 = tpu.matmul %0, %1, %cst {dimension_numbers = #tpu.dot_dimension_numbers<[1], [0], [0], [1], [0, 0, 1, 1], [], []>} : vector<8x784xbf16>, vector<784x8xbf16>, vector<8x8xf32> -> vector<8x8xf32>
    %c0_3 = arith.constant 0 : index
    %c0_4 = arith.constant 0 : index
    %3 = vector.load %arg3[%c0_3, %c0_4] : memref<1x8xf32, #tpu.memory_space<vmem>>, vector<1x8xf32>
    %4 = vector.broadcast %3 : vector<1x8xf32> to vector<8x8xf32>
    %5 = arith.addf %2, %4 : vector<8x8xf32>
    %cst_5 = arith.constant 0.785398185 : f32
    %6 = vector.broadcast %cst_5 : f32 to vector<8x8xf32>
    %7 = arith.mulf %5, %6 : vector<8x8xf32>
    %8 = math.cos %7 : vector<8x8xf32>
    %9 = math.sin %7 : vector<8x8xf32>
    %c0_6 = arith.constant 0 : index
    %c0_7 = arith.constant 0 : index
    %10 = vector.load %arg6[%c0_6, %c0_7] : memref<8x256xf32, #tpu.memory_space<vmem>>, vector<8x256xf32>
    %11 = vector.extract_strided_slice %10 {offsets = [0, 0], sizes = [1, 256], strides = [1, 1]} : vector<8x256xf32> to vector<1x256xf32>
    %cst_8 = arith.constant 0.000000e+00 : f32
    %12 = vector.broadcast %cst_8 : f32 to vector<1x256xf32>
    %13 = arith.cmpf ogt, %11, %12 : vector<1x256xf32>
    %14 = vector.extract_strided_slice %8 {offsets = [0, 0], sizes = [8, 1], strides = [1, 1]} : vector<8x8xf32> to vector<8x1xf32>
    %15 = vector.extract_strided_slice %9 {offsets = [0, 0], sizes = [8, 1], strides = [1, 1]} : vector<8x8xf32> to vector<8x1xf32>
    %16 = vector.shape_cast %13 : vector<1x256xi1> to vector<1x256xi1>
    %17 = vector.broadcast %16 : vector<1x256xi1> to vector<8x256xi1>
    %18 = vector.shape_cast %14 : vector<8x1xf32> to vector<8x1xf32>
    %19 = vector.broadcast %18 : vector<8x1xf32> to vector<8x256xf32>
    %20 = vector.shape_cast %15 : vector<8x1xf32> to vector<8x1xf32>
    %21 = vector.broadcast %20 : vector<8x1xf32> to vector<8x256xf32>
    %22 = arith.select %17, %19, %21 : vector<8x256xi1>, vector<8x256xf32>
    %23 = vector.extract_strided_slice %10 {offsets = [1, 0], sizes = [1, 256], strides = [1, 1]} : vector<8x256xf32> to vector<1x256xf32>
    %cst_9 = arith.constant 0.000000e+00 : f32
    %24 = vector.broadcast %cst_9 : f32 to vector<1x256xf32>
    %25 = arith.cmpf ogt, %23, %24 : vector<1x256xf32>
    %26 = vector.extract_strided_slice %8 {offsets = [0, 1], sizes = [8, 1], strides = [1, 1]} : vector<8x8xf32> to vector<8x1xf32>
    %27 = vector.extract_strided_slice %9 {offsets = [0, 1], sizes = [8, 1], strides = [1, 1]} : vector<8x8xf32> to vector<8x1xf32>
    %28 = vector.shape_cast %25 : vector<1x256xi1> to vector<1x256xi1>
    %29 = vector.broadcast %28 : vector<1x256xi1> to vector<8x256xi1>
    %30 = vector.shape_cast %26 : vector<8x1xf32> to vector<8x1xf32>
    %31 = vector.broadcast %30 : vector<8x1xf32> to vector<8x256xf32>
    %32 = vector.shape_cast %27 : vector<8x1xf32> to vector<8x1xf32>
    %33 = vector.broadcast %32 : vector<8x1xf32> to vector<8x256xf32>
    %34 = arith.select %29, %31, %33 : vector<8x256xi1>, vector<8x256xf32>
    %35 = arith.mulf %22, %34 : vector<8x256xf32>
    %36 = vector.extract_strided_slice %10 {offsets = [2, 0], sizes = [1, 256], strides = [1, 1]} : vector<8x256xf32> to vector<1x256xf32>
    %cst_10 = arith.constant 0.000000e+00 : f32
    %37 = vector.broadcast %cst_10 : f32 to vector<1x256xf32>
    %38 = arith.cmpf ogt, %36, %37 : vector<1x256xf32>
    %39 = vector.extract_strided_slice %8 {offsets = [0, 2], sizes = [8, 1], strides = [1, 1]} : vector<8x8xf32> to vector<8x1xf32>
    %40 = vector.extract_strided_slice %9 {offsets = [0, 2], sizes = [8, 1], strides = [1, 1]} : vector<8x8xf32> to vector<8x1xf32>
    %41 = vector.shape_cast %38 : vector<1x256xi1> to vector<1x256xi1>
    %42 = vector.broadcast %41 : vector<1x256xi1> to vector<8x256xi1>
    %43 = vector.shape_cast %39 : vector<8x1xf32> to vector<8x1xf32>
    %44 = vector.broadcast %43 : vector<8x1xf32> to vector<8x256xf32>
    %45 = vector.shape_cast %40 : vector<8x1xf32> to vector<8x1xf32>
    %46 = vector.broadcast %45 : vector<8x1xf32> to vector<8x256xf32>
    %47 = arith.select %42, %44, %46 : vector<8x256xi1>, vector<8x256xf32>
    %48 = arith.mulf %35, %47 : vector<8x256xf32>
    %49 = vector.extract_strided_slice %10 {offsets = [3, 0], sizes = [1, 256], strides = [1, 1]} : vector<8x256xf32> to vector<1x256xf32>
    %cst_11 = arith.constant 0.000000e+00 : f32
    %50 = vector.broadcast %cst_11 : f32 to vector<1x256xf32>
    %51 = arith.cmpf ogt, %49, %50 : vector<1x256xf32>
    %52 = vector.extract_strided_slice %8 {offsets = [0, 3], sizes = [8, 1], strides = [1, 1]} : vector<8x8xf32> to vector<8x1xf32>
    %53 = vector.extract_strided_slice %9 {offsets = [0, 3], sizes = [8, 1], strides = [1, 1]} : vector<8x8xf32> to vector<8x1xf32>
    %54 = vector.shape_cast %51 : vector<1x256xi1> to vector<1x256xi1>
    %55 = vector.broadcast %54 : vector<1x256xi1> to vector<8x256xi1>
    %56 = vector.shape_cast %52 : vector<8x1xf32> to vector<8x1xf32>
    %57 = vector.broadcast %56 : vector<8x1xf32> to vector<8x256xf32>
    %58 = vector.shape_cast %53 : vector<8x1xf32> to vector<8x1xf32>
    %59 = vector.broadcast %58 : vector<8x1xf32> to vector<8x256xf32>
    %60 = arith.select %55, %57, %59 : vector<8x256xi1>, vector<8x256xf32>
    %61 = arith.mulf %48, %60 : vector<8x256xf32>
    %62 = vector.extract_strided_slice %10 {offsets = [4, 0], sizes = [1, 256], strides = [1, 1]} : vector<8x256xf32> to vector<1x256xf32>
    %cst_12 = arith.constant 0.000000e+00 : f32
    %63 = vector.broadcast %cst_12 : f32 to vector<1x256xf32>
    %64 = arith.cmpf ogt, %62, %63 : vector<1x256xf32>
    %65 = vector.extract_strided_slice %8 {offsets = [0, 4], sizes = [8, 1], strides = [1, 1]} : vector<8x8xf32> to vector<8x1xf32>
    %66 = vector.extract_strided_slice %9 {offsets = [0, 4], sizes = [8, 1], strides = [1, 1]} : vector<8x8xf32> to vector<8x1xf32>
    %67 = vector.shape_cast %64 : vector<1x256xi1> to vector<1x256xi1>
    %68 = vector.broadcast %67 : vector<1x256xi1> to vector<8x256xi1>
    %69 = vector.shape_cast %65 : vector<8x1xf32> to vector<8x1xf32>
    %70 = vector.broadcast %69 : vector<8x1xf32> to vector<8x256xf32>
    %71 = vector.shape_cast %66 : vector<8x1xf32> to vector<8x1xf32>
    %72 = vector.broadcast %71 : vector<8x1xf32> to vector<8x256xf32>
    %73 = arith.select %68, %70, %72 : vector<8x256xi1>, vector<8x256xf32>
    %74 = arith.mulf %61, %73 : vector<8x256xf32>
    %75 = vector.extract_strided_slice %10 {offsets = [5, 0], sizes = [1, 256], strides = [1, 1]} : vector<8x256xf32> to vector<1x256xf32>
    %cst_13 = arith.constant 0.000000e+00 : f32
    %76 = vector.broadcast %cst_13 : f32 to vector<1x256xf32>
    %77 = arith.cmpf ogt, %75, %76 : vector<1x256xf32>
    %78 = vector.extract_strided_slice %8 {offsets = [0, 5], sizes = [8, 1], strides = [1, 1]} : vector<8x8xf32> to vector<8x1xf32>
    %79 = vector.extract_strided_slice %9 {offsets = [0, 5], sizes = [8, 1], strides = [1, 1]} : vector<8x8xf32> to vector<8x1xf32>
    %80 = vector.shape_cast %77 : vector<1x256xi1> to vector<1x256xi1>
    %81 = vector.broadcast %80 : vector<1x256xi1> to vector<8x256xi1>
    %82 = vector.shape_cast %78 : vector<8x1xf32> to vector<8x1xf32>
    %83 = vector.broadcast %82 : vector<8x1xf32> to vector<8x256xf32>
    %84 = vector.shape_cast %79 : vector<8x1xf32> to vector<8x1xf32>
    %85 = vector.broadcast %84 : vector<8x1xf32> to vector<8x256xf32>
    %86 = arith.select %81, %83, %85 : vector<8x256xi1>, vector<8x256xf32>
    %87 = arith.mulf %74, %86 : vector<8x256xf32>
    %88 = vector.extract_strided_slice %10 {offsets = [6, 0], sizes = [1, 256], strides = [1, 1]} : vector<8x256xf32> to vector<1x256xf32>
    %cst_14 = arith.constant 0.000000e+00 : f32
    %89 = vector.broadcast %cst_14 : f32 to vector<1x256xf32>
    %90 = arith.cmpf ogt, %88, %89 : vector<1x256xf32>
    %91 = vector.extract_strided_slice %8 {offsets = [0, 6], sizes = [8, 1], strides = [1, 1]} : vector<8x8xf32> to vector<8x1xf32>
    %92 = vector.extract_strided_slice %9 {offsets = [0, 6], sizes = [8, 1], strides = [1, 1]} : vector<8x8xf32> to vector<8x1xf32>
    %93 = vector.shape_cast %90 : vector<1x256xi1> to vector<1x256xi1>
    %94 = vector.broadcast %93 : vector<1x256xi1> to vector<8x256xi1>
    %95 = vector.shape_cast %91 : vector<8x1xf32> to vector<8x1xf32>
    %96 = vector.broadcast %95 : vector<8x1xf32> to vector<8x256xf32>
    %97 = vector.shape_cast %92 : vector<8x1xf32> to vector<8x1xf32>
    %98 = vector.broadcast %97 : vector<8x1xf32> to vector<8x256xf32>
    %99 = arith.select %94, %96, %98 : vector<8x256xi1>, vector<8x256xf32>
    %100 = arith.mulf %87, %99 : vector<8x256xf32>
    %101 = vector.extract_strided_slice %10 {offsets = [7, 0], sizes = [1, 256], strides = [1, 1]} : vector<8x256xf32> to vector<1x256xf32>
    %cst_15 = arith.constant 0.000000e+00 : f32
    %102 = vector.broadcast %cst_15 : f32 to vector<1x256xf32>
    %103 = arith.cmpf ogt, %101, %102 : vector<1x256xf32>
    %104 = vector.extract_strided_slice %8 {offsets = [0, 7], sizes = [8, 1], strides = [1, 1]} : vector<8x8xf32> to vector<8x1xf32>
    %105 = vector.extract_strided_slice %9 {offsets = [0, 7], sizes = [8, 1], strides = [1, 1]} : vector<8x8xf32> to vector<8x1xf32>
    %106 = vector.shape_cast %103 : vector<1x256xi1> to vector<1x256xi1>
    %107 = vector.broadcast %106 : vector<1x256xi1> to vector<8x256xi1>
    %108 = vector.shape_cast %104 : vector<8x1xf32> to vector<8x1xf32>
    %109 = vector.broadcast %108 : vector<8x1xf32> to vector<8x256xf32>
    %110 = vector.shape_cast %105 : vector<8x1xf32> to vector<8x1xf32>
    %111 = vector.broadcast %110 : vector<8x1xf32> to vector<8x256xf32>
    %112 = arith.select %107, %109, %111 : vector<8x256xi1>, vector<8x256xf32>
    %113 = arith.mulf %100, %112 : vector<8x256xf32>
    %114 = arith.truncf %113 : vector<8x256xf32> to vector<8x256xbf16>
    %c0_16 = arith.constant 0 : index
    %c0_17 = arith.constant 0 : index
    %115 = vector.load %arg4[%c0_16, %c0_17] : memref<256x256xbf16, #tpu.memory_space<vmem>>, vector<256x256xbf16>
    %cst_18 = arith.constant dense<0.000000e+00> : vector<8x256xf32>
    %116 = tpu.matmul %114, %115, %cst_18 {dimension_numbers = #tpu.dot_dimension_numbers<[1], [0], [0], [1], [0, 0, 1, 1], [], []>} : vector<8x256xbf16>, vector<256x256xbf16>, vector<8x256xf32> -> vector<8x256xf32>
    %117 = arith.mulf %116, %116 : vector<8x256xf32>
    %c0_19 = arith.constant 0 : index
    %c0_20 = arith.constant 0 : index
    %118 = vector.load %arg5[%c0_19, %c0_20] : memref<256x256xbf16, #tpu.memory_space<vmem>>, vector<256x256xbf16>
    %cst_21 = arith.constant dense<0.000000e+00> : vector<8x256xf32>
    %119 = tpu.matmul %114, %118, %cst_21 {dimension_numbers = #tpu.dot_dimension_numbers<[1], [0], [0], [1], [0, 0, 1, 1], [], []>} : vector<8x256xbf16>, vector<256x256xbf16>, vector<8x256xf32> -> vector<8x256xf32>
    %120 = arith.mulf %119, %119 : vector<8x256xf32>
    %121 = arith.addf %117, %120 : vector<8x256xf32>
    %122 = arith.truncf %121 : vector<8x256xf32> to vector<8x256xbf16>
    %c0_22 = arith.constant 0 : index
    %c0_23 = arith.constant 0 : index
    %123 = vector.load %arg7[%c0_22, %c0_23] : memref<256x128xbf16, #tpu.memory_space<vmem>>, vector<256x128xbf16>
    %cst_24 = arith.constant dense<0.000000e+00> : vector<8x128xf32>
    %124 = tpu.matmul %122, %123, %cst_24 {dimension_numbers = #tpu.dot_dimension_numbers<[1], [0], [0], [1], [0, 0, 1, 1], [], []>} : vector<8x256xbf16>, vector<256x128xbf16>, vector<8x128xf32> -> vector<8x128xf32>
    %c0_25 = arith.constant 0 : index
    %c0_26 = arith.constant 0 : index
    %125 = vector.load %arg8[%c0_25, %c0_26] : memref<1x128xf32, #tpu.memory_space<vmem>>, vector<1x128xf32>
    %126 = vector.broadcast %125 : vector<1x128xf32> to vector<8x128xf32>
    %127 = arith.addf %124, %126 : vector<8x128xf32>
    %128 = arith.truncf %127 : vector<8x128xf32> to vector<8x128xbf16>
    %c0_27 = arith.constant 0 : index
    %c0_28 = arith.constant 0 : index
    %129 = vector.load %arg9[%c0_27, %c0_28] : memref<8x128xbf16, #tpu.memory_space<vmem>>, vector<8x128xbf16>
    tpu.vector_store %arg9[%c0_27, %c0_28], %128 {strides = array<i32>} : memref<8x128xbf16, #tpu.memory_space<vmem>>, vector<8x128xbf16>,
    return
  }
  func.func @transform_0(%arg0: i32) -> (i32, i32) {
    %c0_i32 = arith.constant 0 : i32
    %c0_i32_0 = arith.constant 0 : i32
    return %arg0, %c0_i32 : i32, i32
  }
  func.func @transform_1(%arg0: i32) -> (i32, i32) {
    %c0_i32 = arith.constant 0 : i32
    %c0_i32_0 = arith.constant 0 : i32
    %c0_i32_1 = arith.constant 0 : i32
    return %c0_i32, %c0_i32_0 : i32, i32
  }
  func.func @transform_2(%arg0: i32) -> (i32, i32) {
    %c0_i32 = arith.constant 0 : i32
    %c0_i32_0 = arith.constant 0 : i32
    %c0_i32_1 = arith.constant 0 : i32
    return %c0_i32, %c0_i32_0 : i32, i32
  }
  func.func @transform_3(%arg0: i32) -> (i32, i32) {
    %c0_i32 = arith.constant 0 : i32
    %c0_i32_0 = arith.constant 0 : i32
    %c0_i32_1 = arith.constant 0 : i32
    return %c0_i32, %c0_i32_0 : i32, i32
  }
  func.func @transform_4(%arg0: i32) -> (i32, i32) {
    %c0_i32 = arith.constant 0 : i32
    %c0_i32_0 = arith.constant 0 : i32
    %c0_i32_1 = arith.constant 0 : i32
    return %c0_i32, %c0_i32_0 : i32, i32
  }
  func.func @transform_5(%arg0: i32) -> (i32, i32) {
    %c0_i32 = arith.constant 0 : i32
    %c0_i32_0 = arith.constant 0 : i32
    %c0_i32_1 = arith.constant 0 : i32
    return %c0_i32, %c0_i32_0 : i32, i32
  }
  func.func @transform_6(%arg0: i32) -> (i32, i32) {
    %c0_i32 = arith.constant 0 : i32
    %c0_i32_0 = arith.constant 0 : i32
    %c0_i32_1 = arith.constant 0 : i32
    return %c0_i32, %c0_i32_0 : i32, i32
  }
  func.func @transform_7(%arg0: i32) -> (i32, i32) {
    %c0_i32 = arith.constant 0 : i32
    %c0_i32_0 = arith.constant 0 : i32
    %c0_i32_1 = arith.constant 0 : i32
    return %c0_i32, %c0_i32_0 : i32, i32
  }
  func.func @transform_8(%arg0: i32) -> (i32, i32) {
    %c0_i32 = arith.constant 0 : i32
    %c0_i32_0 = arith.constant 0 : i32
    return %arg0, %c0_i32 : i32, i32
  }
}

</mosaic_0001>

<bundles_post_ra>
// kernel: tpu_custom_call.1
= control target key start
LH: loop header
LB: loop body
LE: loop exit
PB: predicated region body
PF: predicated region fallthrough
CT: control target
= control target key end

     0   :  { %13 = vsyncpa [#allocation3], 0  ;;  %s2654_s0 = inlined_call_operand.vmem [shape: bf16[8,784], index: 0, kind: input, shape index: {}]   ;;  %s2655_s1 = inlined_call_operand.vmem [shape: bf16[784,8], index: 1, kind: input, shape index: {}]   ;;  %s2656_s2 = inlined_call_operand.vmem [shape: f32[1,8], index: 2, kind: input, shape index: {}]   ;;  %s2657_s3 = inlined_call_operand.vmem [shape: bf16[256,256], index: 3, kind: input, shape index: {}]   ;;  %s2658_s4 = inlined_call_operand.hbm [shape: bf16[256,256], index: 4, kind: input, shape index: {}]   ;;  %s2659_s5 = inlined_call_operand.vmem [shape: f32[8,256], index: 5, kind: input, shape index: {}]   ;;  %s2660_s6 = inlined_call_operand.vmem [shape: bf16[256,128], index: 6, kind: input, shape index: {}]   ;;  %s2661_s7 = inlined_call_operand.vmem [shape: f32[1,128], index: 7, kind: input, shape index: {}]   ;;  %s2662_s8 = inlined_call_operand.hbm [shape: bf16[8,128], index: 8, kind: output, shape index: {}]  }
   0x1   :  { %14 = vsyncpa [#allocation4], 0  ;;  %s2194_s27 = smov [#allocation2]   ;;  %s2146_s9 = scalar_lea.hbm %s2658_s4, 4096 }
   0x2   :  { %s28_s28 = sshll.u32 %s2194_s27, 4  ;;  %p2147_p0 = scmp.ne.s32.totalorder %s2658_s4, %s2146_s9  ;;  %s29_s28 = int_to_ptr.vmem [resolvable:$true] %s28_s28 }
   0x3   :  { %p2150_p1 = scmp.lt.u32.totalorder %s2146_s9, %s2658_s4 }
   0x5   :  { %p2152_p2 = pnand %p2150_p1, %p2147_p0 }
   0x7   :  { %2155 = shalt.err (!%p2152_p2)
}
   0x8   :  { %s2156_s14 = scalar_lea.vmem %s29_s28, 4096  ;;  %p2161_p4 = scmp.lt.s32.totalorder %s29_s28, %s29_s28 }
   0x9   :  { %p2157_p3 = scmp.ne.s32.totalorder %s29_s28, %s2156_s14  ;;  %p2162_p5 = scmp.lt.s32.totalorder %s2156_s14, %s2156_s14 }
   0xb   :  { %p2163_p6 = por %p2162_p5, %p2161_p4 }
   0xd   :  { %p2164_p7 = pnand %p2163_p6, %p2157_p3 }
   0xf   :  { %2167 = shalt.err (!%p2164_p7)
}
  0x10   :  { %s2195_s15 = smov 128   ;;  %s2196_s16 = smov 8  }
  0x11   :  { %34 = dma.hbm_to_vmem [thread:$0]  %s2658_s4, 4096, %s29_s28, [#allocation3], %s2195_s15, %s2195_s15, %s2196_s16  }
  0x12   :  { %2190 = dma.done.wait [#allocation3], 4096  }
  0x13   :  { %2191 = vsyncadd [#allocation3], 4294963200  ;;  %v1974_v0 = vld [vmem:[%s2655_s1 + $0x40] sm:$0xff]   ;;  %v1978_v4 = vld [vmem:[%s2655_s1 + $0x48] sm:$0xff]   ;;  %v2197_v43 = vmov 0.0   ;;  %vm2198_vm0 = vmmov 0  }
  0x14   :  { %v1975_v1 = vld [vmem:[%s2655_s1] sm:$0xff]   ;;  %1841 = vmatprep.subr.bf16.mxu0 %v1974_v0  ;;  %v1979_v5 = vld [vmem:[%s2655_s1 + $0x8] sm:$0xff]   ;;  %v1982_v8 = vld [vmem:[%s2655_s1 + $0x50] sm:$0xff]   ;;  %vm472_vm1 = vcmask 130048   ;;  %v2199_v60 = vmov 1   ;;  %v2200_v61 = vmov 0  }
  0x15   :  { %v1976_v2 = vld [vmem:[%s2655_s1 + $0xc0] sm:$0xff]   ;;  %1842 = vmatpush3.bf16.msra.mxu0 %v1975_v1  ;;  %v1980_v6 = vld [vmem:[%s2655_s1 + $0xc8] sm:$0xff]   ;;  %v1983_v9 = vld [vmem:[%s2655_s1 + $0x10] sm:$0xff]   ;;  %1962 = vset.pattern.permute.xlu1 %v2199_v60  ;;  %v2205_v60 = vmov 920167782   ;;  %s2213_s27 = smov [#allocation5]  }
  0x16   :  { %v1977_v3 = vld [vmem:[%s2655_s1 + $0x80] sm:$0xff]   ;;  %1863 = vmatprep.subr.bf16.mxu1 %v1976_v2  ;;  %1843 = vmatprep.subr.bf16.mxu0 %v1978_v4  ;;  %v1981_v7 = vld [vmem:[%s2655_s1 + $0x88] sm:$0xff]   ;;  %v1984_v10 = vld [vmem:[%s2655_s1 + $0xd0] sm:$0xff]   ;;  %s1685_s28 = sshll.u32 %s2213_s27, 4  ;;  %s1686_s28 = int_to_ptr.vmem [resolvable:$true] %s1685_s28 }
  0x17   :  { %1864 = vmatpush3.bf16.msra.mxu1 %v1977_v3  ;;  %v1985_v11 = vld [vmem:[%s2655_s1 + $0x90] sm:$0xff]   ;;  %v1986_v12 = vld [vmem:[%s2655_s1 + $0x58] sm:$0xff]   ;;  %v1990_v16 = vld [vmem:[%s2655_s1 + $0x60] sm:$0xff]   ;;  %1961 = vset.pattern.permute.xlu0 %v2200_v61  ;;  %s2168_s29 = scalar_lea.vmem %s1686_s28, 64  ;;  %p2173_p9 = scmp.lt.s32.totalorder %s1686_s28, %s1686_s28 }
  0x18   :  { %1865 = vmatprep.subr.bf16.mxu1 %v1980_v6  ;;  %v1987_v13 = vld [vmem:[%s2655_s1 + $0x18] sm:$0xff]   ;;  %v1991_v17 = vld [vmem:[%s2655_s1 + $0x20] sm:$0xff]   ;;  %v1994_v20 = vld [vmem:[%s2655_s1 + $0x68] sm:$0xff]   ;;  %p2169_p8 = scmp.ne.s32.totalorder %s1686_s28, %s2168_s29  ;;  %p2174_p10 = scmp.lt.s32.totalorder %s2168_s29, %s2168_s29 }
  0x19   :  { %1844 = vmatpush3.bf16.msra.mxu0 %v1979_v5  ;;  %v1988_v14 = vld [vmem:[%s2655_s1 + $0xd8] sm:$0xff]   ;;  %v1992_v18 = vld [vmem:[%s2655_s1 + $0xe0] sm:$0xff]   ;;  %v1995_v21 = vld [vmem:[%s2655_s1 + $0x28] sm:$0xff]  }
  0x1a   :  { %1845 = vmatprep.subr.bf16.mxu0 %v1982_v8  ;;  %v1989_v15 = vld [vmem:[%s2655_s1 + $0x98] sm:$0xff]   ;;  %v1993_v19 = vld [vmem:[%s2655_s1 + $0xa0] sm:$0xff]   ;;  %v1996_v22 = vld [vmem:[%s2655_s1 + $0xe8] sm:$0xff]   ;;  %p2175_p11 = por %p2174_p10, %p2173_p9 }
  0x1b   :  { %1866 = vmatpush3.bf16.msra.mxu1 %v1981_v7  ;;  %v1997_v23 = vld [vmem:[%s2655_s1 + $0xa8] sm:$0xff]   ;;  %v1998_v24 = vld [vmem:[%s2655_s1 + $0x70] sm:$0xff]   ;;  %v2002_v28 = vld [vmem:[%s2655_s1 + $0x78] sm:$0xff]  }
  0x1c   :  { %1867 = vmatprep.subr.bf16.mxu1 %v1984_v10  ;;  %v1999_v25 = vld [vmem:[%s2655_s1 + $0x30] sm:$0xff]   ;;  %v2003_v29 = vld [vmem:[%s2655_s1 + $0x38] sm:$0xff]   ;;  %v45_v31 = vld [vmem:[%s2654_s0] sm:$0xff]  ;;  %p2176_p12 = pnand %p2175_p11, %p2169_p8 }
  0x1d   :  { %1846 = vmatpush3.bf16.msra.mxu0 %v1983_v9  ;;  %v2000_v26 = vld [vmem:[%s2655_s1 + $0xf0] sm:$0xff]   ;;  %v2004_v30 = vld [vmem:[%s2655_s1 + $0xf8] sm:$0xff]   ;;  %v1695_v32 = vcombine.low %v45_v31, %v45_v31  ;;  %v1696_v33 = vcombine.high %v45_v31, %v45_v31  ;;  %v2008_v35 = vld [vmem:[%s2655_s1 + $0x140] sm:$0xff]  }
  0x1e   :  { %1847 = vmatprep.subr.bf16.mxu0 %v1986_v12  ;;  %v2001_v27 = vld [vmem:[%s2655_s1 + $0xb0] sm:$0xff]   ;;  %v2007_v34 = vld [vmem:[%s2655_s1 + $0xb8] sm:$0xff]   ;;  %v46_v36 = vld [vmem:[%s2654_s0 + $0x8] sm:$0xff] }
  0x1f   :  { %1868 = vmatpush3.bf16.msra.mxu1 %v1985_v11  ;;  %508 = vmatprep.mubr.bf16.mxu0 %v1696_v33  ;;  %v1697_v37 = vcombine.low %v46_v36, %v46_v36  ;;  %v1698_v38 = vcombine.high %v46_v36, %v46_v36  ;;  %v2011_v39 = vld [vmem:[%s2655_s1 + $0x100] sm:$0xff]   ;;  %v2012_v40 = vld [vmem:[%s2655_s1 + $0x148] sm:$0xff]   ;;  %v2014_v42 = vld [vmem:[%s2655_s1 + $0x150] sm:$0xff]  }
  0x20   :  { %1869 = vmatprep.subr.bf16.mxu1 %v1988_v14  ;;  %v2013_v41 = vld [vmem:[%s2655_s1 + $0x108] sm:$0xff]   ;;  %v2015_v44 = vld [vmem:[%s2655_s1 + $0x110] sm:$0xff]   ;;  %v2016_v45 = vld [vmem:[%s2655_s1 + $0x158] sm:$0xff]  }
  0x21   :  { %1848 = vmatpush3.bf16.msra.mxu0 %v1987_v13  ;;  %548 = vmatprep.mubr.bf16.mxu1 %v1698_v38  ;;  %v2017_v46 = vld [vmem:[%s2655_s1 + $0x118] sm:$0xff]   ;;  %v2018_v47 = vld [vmem:[%s2655_s1 + $0x160] sm:$0xff]   ;;  %v2020_v49 = vld [vmem:[%s2655_s1 + $0x168] sm:$0xff]  }
  0x22   :  { %1849 = vmatprep.subr.bf16.mxu0 %v1990_v16  ;;  %v2019_v48 = vld [vmem:[%s2655_s1 + $0x120] sm:$0xff]   ;;  %v47_v51 = vld [vmem:[%s2654_s0 + $0x10] sm:$0xff]  ;;  %v2021_v52 = vld [vmem:[%s2655_s1 + $0x128] sm:$0xff]  }
  0x23   :  { %1870 = vmatpush3.bf16.msra.mxu1 %v1989_v15  ;;  %v2026_v50 = vld [vmem:[%s2655_s1 + $0x180] sm:$0xff]   ;;  %v1700_v53 = vcombine.high %v47_v51, %v47_v51  ;;  %v2029_v54 = vld [vmem:[%s2654_s0 + $0x18] ss:$0 sps:$4 sm:$0xff]   ;;  %v2022_v55 = vld [vmem:[%s2655_s1 + $0x170] sm:$0xff]   ;;  %v1699_v59 = vcombine.low %v47_v51, %v47_v51  ;;  %v2202_v51 = vmov 2475754826  }
  0x24   :  { %1871 = vmatprep.subr.bf16.mxu1 %v1992_v18  ;;  %v2023_v56 = vld [vmem:[%s2655_s1 + $0x130] sm:$0xff]   ;;  %v2024_v57 = vld [vmem:[%s2655_s1 + $0x178] sm:$0xff]   ;;  %v1694_v63 = vld [vmem:[%s2656_s2] ss:$0 sm:$0xff] }
  0x25   :  { %1850 = vmatpush3.bf16.msra.mxu0 %v1991_v17  ;;  %v2025_v58 = vld [vmem:[%s2655_s1 + $0x138] sm:$0xff]   ;;  %v2047_v33 = vld [vmem:[#allocation2 + $0x24] ss:$8 sps:$4 sm:$0xff]  }
  0x26   :  { %1851 = vmatprep.subr.bf16.mxu0 %v1994_v20  ;;  %v2039_v31 = vld [vmem:[#allocation2 + $0x10] ss:$8 sps:$4 sm:$0xff]   ;;  %v2050_v38 = vld [vmem:[%s2657_s3 + $0x34] ss:$8 sps:$4 sm:$0xff]  }
  0x27   :  { %1872 = vmatpush3.bf16.msra.mxu1 %v1993_v19 }
  0x28   :  { %1873 = vmatprep.subr.bf16.mxu1 %v1996_v22  ;;  %v2030_v22 = vld [vmem:[%s2657_s3] ss:$8 sps:$4 sm:$0xff]  }
  0x29   :  { %1852 = vmatpush3.bf16.msra.mxu0 %v1995_v21 }
  0x2a   :  { %1853 = vmatprep.subr.bf16.mxu0 %v1998_v24  ;;  %v2033_v24 = vld [vmem:[#allocation2] ss:$8 sps:$4 sm:$0xff]  }
  0x2b   :  { %1874 = vmatpush3.bf16.msra.mxu1 %v1997_v23  ;;  %v2032_v23 = vld [vmem:[%s2657_s3 + $0x4] ss:$8 sps:$4 sm:$0xff]  }
  0x2c   :  { %1875 = vmatprep.subr.bf16.mxu1 %v2000_v26  ;;  %v2038_v26 = vld [vmem:[%s2657_s3 + $0x14] ss:$8 sps:$4 sm:$0xff]  }
  0x2d   :  { %1854 = vmatpush3.bf16.msra.mxu0 %v1999_v25  ;;  %v2035_v25 = vld [vmem:[#allocation2 + $0x4] ss:$8 sps:$4 sm:$0xff]  }
  0x2e   :  { %1855 = vmatprep.subr.bf16.mxu0 %v2002_v28  ;;  %v2041_v28 = vld [vmem:[#allocation2 + $0x14] ss:$8 sps:$4 sm:$0xff]  }
  0x2f   :  { %1876 = vmatpush3.bf16.msra.mxu1 %v2001_v27 }
  0x30   :  { %1877 = vmatprep.subr.bf16.mxu1 %v2004_v30 }
  0x31   :  { %1856 = vmatpush3.bf16.msra.mxu0 %v2003_v29  ;;  %v2036_v29 = vld [vmem:[%s2657_s3 + $0x10] ss:$8 sps:$4 sm:$0xff]  }
  0x32   :  { %1885 = vmatprep.subr.bf16.mxu0 %v2008_v35  ;;  %v2042_v35 = vld [vmem:[%s2657_s3 + $0x20] ss:$8 sps:$4 sm:$0xff]  }
  0x33   :  { %1878 = vmatpush3.bf16.msra.mxu1 %v2007_v34 }
  0x34   :  { %509 = vmatmul.mubr.bf16.vlgmr.msra.gmra.mrb[0].mxu0 %v1695_v32  ;;  %1931 = vmatprep.subr.bf16.mxu1 %v2197_v43  ;;  %v2044_v32 = vld [vmem:[%s2657_s3 + $0x24] ss:$8 sps:$4 sm:$0xff]  }
  0x35   :  { %1886 = vmatpush3.bf16.msra.mxu0 %v2011_v39  ;;  %588 = vmatprep.mubr.bf16.mxu0 %v1700_v53  ;;  %v2053_v39 = vld [vmem:[#allocation2 + $0x34] ss:$8 sps:$4 sm:$0xff]  }
  0x36   :  { %549 = vmatmul.mubr.bf16.vlgmr.msra.gmra.mrb[0].mxu1 %v1697_v37  ;;  %1887 = vmatprep.subr.bf16.mxu0 %v2012_v40  ;;  %v2045_v37 = vld [vmem:[#allocation2 + $0x20] ss:$8 sps:$4 sm:$0xff]  }
  0x37   :  { %1933 = vmatprep.mubr.msk.bf16.mxu1 %vm2198_vm0, %v2197_v43  ;;  %1932 = vmatpush3.bf16.msra.mxu1 %v2026_v50  ;;  %v2051_v43 = vld [vmem:[#allocation2 + $0x30] ss:$8 sps:$4 sm:$0xff]  }
  0x38   :  { %1220 = vmatprep.subr.bf16.mxu1 %v2032_v23 }
  0x39   :  { %1888 = vmatpush3.bf16.msra.mxu0 %v2013_v41  ;;  %v2048_v41 = vld [vmem:[%s2657_s3 + $0x30] ss:$8 sps:$4 sm:$0xff]  }
  0x3a   :  { %1889 = vmatprep.subr.bf16.mxu0 %v2014_v42 }
  0x3d   :  { %1890 = vmatpush3.bf16.msra.mxu0 %v2015_v44 }
  0x3e   :  { %1891 = vmatprep.subr.bf16.mxu0 %v2016_v45  ;;  %1934 = vmatmul.mubr.msk.bf16.vlgmr.msra.gmra.mrb[4].mxu1 %vm472_vm1, %v2029_v54  ;;  %v2203_v54 = vmov 2131351028  }
  0x3f   :  { %1221 = vmatpush1.bf16.msra.mxu1 %v2030_v22 }
  0x40   :  { %1222 = vmatprep.subr.bf16.mxu1 %v2038_v26 }
  0x41   :  { %1892 = vmatpush3.bf16.msra.mxu0 %v2017_v46 }
  0x42   :  { %1893 = vmatprep.subr.bf16.mxu0 %v2018_v47 }
  0x43   :  { %1223 = vmatpush1.bf16.msra.mxu1 %v2036_v29 }
  0x44   :  { %1224 = vmatprep.subr.bf16.mxu1 %v2044_v32 }
  0x45   :  { %1894 = vmatpush3.bf16.msra.mxu0 %v2019_v48 }
  0x46   :  { %1895 = vmatprep.subr.bf16.mxu0 %v2020_v49  ;;  %v2201_v49 = vmov 683565275  }
  0x47   :  { %1225 = vmatpush1.bf16.msra.mxu1 %v2042_v35 }
  0x48   :  { %1226 = vmatprep.subr.bf16.mxu1 %v2050_v38 }
  0x49   :  { %1896 = vmatpush3.bf16.msra.mxu0 %v2021_v52 }
  0x4a   :  { %1897 = vmatprep.subr.bf16.mxu0 %v2022_v55 }
  0x4b   :  { %1227 = vmatpush1.bf16.msra.mxu1 %v2048_v41 }
  0x4d   :  { %1898 = vmatpush3.bf16.msra.mxu0 %v2023_v56 }
  0x4e   :  { %1899 = vmatprep.subr.bf16.mxu0 %v2024_v57  ;;  %v2204_v57 = vmov 2102212464  }
  0x51   :  { %1900 = vmatpush3.bf16.msra.mxu0 %v2025_v58 }
  0x52   :  { %1455 = vmatprep.subr.bf16.mxu0 %v2035_v25 }
  0x54   :  { %589 = vmatmul.mubr.bf16.vlgmr.msra.gmra.mrb[4].mxu0 %v1699_v59 }
  0x55   :  { %1456 = vmatpush1.bf16.msra.mxu0 %v2033_v24 }
  0x56   :  { %1457 = vmatprep.subr.bf16.mxu0 %v2041_v28 }
  0x59   :  { %1458 = vmatpush1.bf16.msra.mxu0 %v2039_v31 }
  0x5a   :  { %1459 = vmatprep.subr.bf16.mxu0 %v2047_v33 }
  0x5d   :  { %1460 = vmatpush1.bf16.msra.mxu0 %v2045_v37 }
  0x5e   :  { %1461 = vmatprep.subr.bf16.mxu0 %v2053_v39 }
  0x61   :  { %1462 = vmatpush1.bf16.msra.mxu0 %v2051_v43 }
 0x107   :  { %v1857_v62 = vpop.f32.mrb[0].mxu0 }
 0x108   :  { %v1858_v0 = vpop.f32.mrb[1].mxu0 }
 0x109   :  { %v1859_v1 = vadd.f32 %v1858_v0, %v1857_v62  ;;  %v1860_v2 = vpop.f32.mrb[2].mxu0  ;;  %v1879_v3 = vpop.f32.mrb[0].mxu1  ;;  %v2206_v0 = vmov 1326507024  }
 0x10a   :  { %v1861_v4 = vpop.f32.mrb[3].mxu0  ;;  %v1880_v5 = vpop.f32.mrb[1].mxu1 }
 0x10b   :  { %v511_v6 = vadd.f32 %v1859_v1, %v1694_v63  ;;  %v1881_v7 = vadd.f32 %v1880_v5, %v1879_v3  ;;  %v1882_v8 = vpop.f32.mrb[2].mxu1 }
 0x10c   :  { %v1883_v9 = vpop.f32.mrb[3].mxu1 }
 0x10d   :  { %v551_v10 = vadd.f32 %v1881_v7, %v511_v6 }
 0x111   :  { %v630_v11 = vpop.f32.mrb[4].mxu1 }
 0x112   :  { %v1935_v12 = vpop.f32.mrb[5].mxu1 }
 0x113   :  { %v633_v13 = vpop.f32.mrb[6].mxu1 }
 0x114   :  { %v1936_v14 = vpop.f32.mrb[7].mxu1 }
 0x127   :  { %v1901_v15 = vpop.f32.mrb[4].mxu0 }
 0x128   :  { %v1902_v16 = vpop.f32.mrb[5].mxu0 }
 0x129   :  { %v1903_v17 = vadd.f32 %v1902_v16, %v1901_v15  ;;  %v1904_v18 = vpop.f32.mrb[6].mxu0 }
 0x12a   :  { %v1905_v19 = vpop.f32.mrb[7].mxu0 }
 0x12b   :  { %v591_v20 = vadd.f32 %v1903_v17, %v551_v10 }
 0x12d   :  { %v631_v21 = vadd.f32 %v630_v11, %v591_v20 }
 0x12f   :  { %v2443_v27 = vmul.f32 0.7853982, %v631_v21 }
 0x131   :  { %v640_v30 = vand.u32 2139095040, %v2443_v27  ;;  %v637_v42 = vand.u32 2147483647, %v2443_v27  ;;  %vm639_vm9 = vcmp.lt.s32.totalorder %v2443_v27, 0  ;;  %vm729_vm1 = vweird.f32 %v2443_v27 }
 0x133   :  { %v641_v34 = vshrl.u32 %v640_v30, 23  ;;  %v644_v46 = vand.u32 8388607, %v637_v42  ;;  %vm638_vm10 = vcmp.le.f32.partialorder %v637_v42, 0.7853982 }
 0x135   :  { %v1752_v36 = vadd.s32 4294967169, %v641_v34  ;;  %v645_v2 = vor.u32 8388608, %v644_v46 }
 0x137   :  { %v647_v40 = vadd.s32 1, %v1752_v36  ;;  %v685_v16 = vshll.u32 %v645_v2, 8 }
 0x139   :  { %vm648_vm2 = vcmp.gt.s32.totalorder %v647_v40, 0 }
 0x13a   :  { %v649_v44 = vsel %vm648_vm2, %v647_v40, 0 }
 0x13b   :  { %v651_v45 = vand.u32 31, %v649_v44  ;;  %v650_v48 = vshrl.u32 %v649_v44, 5 }
 0x13d   :  { %v652_v47 = vsub.s32 32, %v651_v45  ;;  %v654_v50 = vshll.u32 %v2201_v49, %v651_v45  ;;  %v657_v52 = vshll.u32 %v2202_v51, %v651_v45  ;;  %v660_v56 = vshll.u32 %v2203_v54, %v651_v45 }
 0x13e   :  { %v663_v59 = vshll.u32 %v2204_v57, %v651_v45  ;;  %v666_v63 = vshll.u32 %v2205_v60, %v651_v45  ;;  %vm669_vm3 = vcmp.lt.s32.totalorder %v650_v48, 1  ;;  %vm672_vm4 = vcmp.lt.s32.totalorder %v650_v48, 4 }
 0x13f   :  { %v655_v53 = vshrl.u32 %v2202_v51, %v652_v47  ;;  %v658_v55 = vshrl.u32 %v2203_v54, %v652_v47  ;;  %v661_v58 = vshrl.u32 %v2204_v57, %v652_v47  ;;  %v664_v62 = vshrl.u32 %v2205_v60, %v652_v47 }
 0x140   :  { %v667_v1 = vshrl.u32 %v2206_v0, %v652_v47  ;;  %v653_v11 = vshrl.u32 %v2201_v49, %v652_v47  ;;  %vm671_vm5 = vcmp.lt.s32.totalorder %v650_v48, 3  ;;  %vm670_vm6 = vcmp.lt.s32.totalorder %v650_v48, 2 }
 0x141   :  { %v656_v3 = vor.u32 %v655_v53, %v654_v50  ;;  %v659_v4 = vor.u32 %v658_v55, %v657_v52  ;;  %v662_v5 = vor.u32 %v661_v58, %v660_v56  ;;  %v665_v6 = vor.u32 %v664_v62, %v663_v59 }
 0x142   :  { %v668_v7 = vor.u32 %v667_v1, %v666_v63 }
 0x143   :  { %v674_v8 = vsel %vm672_vm4, %v662_v5, 2102212464  ;;  %v677_v9 = vsel %vm669_vm3, %v656_v3, %v659_v4  ;;  %v681_v10 = vsel %vm669_vm3, %v659_v4, %v662_v5  ;;  %v678_v12 = vsel %vm672_vm4, %v665_v6, 920167782 }
 0x144   :  { %v682_v13 = vsel %vm672_vm4, %v668_v7, 1326507024  ;;  %v679_v14 = vsel %vm671_vm5, %v662_v5, %v678_v12  ;;  %v673_v17 = vsel %vm669_vm3, %v653_v11, %v656_v3  ;;  %v675_v18 = vsel %vm671_vm5, %v659_v4, %v674_v8  ;;  %v2056_v11 = vld [vmem:[%s2657_s3 + $0x44] ss:$8 sps:$4 sm:$0xff]   ;;  %v2057_v12 = vld [vmem:[#allocation2 + $0x40] ss:$8 sps:$4 sm:$0xff]  }
 0x145   :  { %v683_v15 = vsel %vm671_vm5, %v665_v6, %v682_v13  ;;  %v680_v19 = vsel %vm670_vm6, %v677_v9, %v679_v14  ;;  %v676_v25 = vsel %vm670_vm6, %v673_v17, %v675_v18  ;;  %1228 = vmatprep.subr.bf16.mxu1 %v2056_v11  ;;  %v2062_v13 = vld [vmem:[%s2657_s3 + $0x54] ss:$8 sps:$4 sm:$0xff]   ;;  %v2068_v17 = vld [vmem:[%s2657_s3 + $0x64] ss:$8 sps:$4 sm:$0xff]  }
 0x146   :  { %v684_v20 = vsel %vm670_vm6, %v681_v10, %v683_v15  ;;  %v2467_v23 = vmul.u32.u64.low %v685_v16, %v680_v19  ;;  %v2468_v24 = vmul.u32.u64.high %v685_v16, %v680_v19, %v2467_v23  ;;  %v692_v28 = vmul.u32 %v685_v16, %v676_v25  ;;  %v2054_v10 = vld [vmem:[%s2657_s3 + $0x40] ss:$8 sps:$4 sm:$0xff]   ;;  %v2065_v14 = vld [vmem:[#allocation2 + $0x54] ss:$8 sps:$4 sm:$0xff]   ;;  %v2060_v15 = vld [vmem:[%s2657_s3 + $0x50] ss:$8 sps:$4 sm:$0xff]  }
 0x147   :  { %v2464_v21 = vmul.u32.u64.low %v685_v16, %v684_v20  ;;  %v2465_v22 = vmul.u32.u64.high %v685_v16, %v684_v20, %v2464_v21  ;;  %1229 = vmatpush1.bf16.msra.mxu1 %v2054_v10  ;;  %v2063_v16 = vld [vmem:[#allocation2 + $0x50] ss:$8 sps:$4 sm:$0xff]   ;;  %v2071_v18 = vld [vmem:[#allocation2 + $0x64] ss:$8 sps:$4 sm:$0xff]   ;;  %v2066_v19 = vld [vmem:[%s2657_s3 + $0x60] ss:$8 sps:$4 sm:$0xff]  }
 0x148   :  { %v695_v26 = vadd.s32 1, %v2468_v24  ;;  %1230 = vmatprep.subr.bf16.mxu1 %v2062_v13  ;;  %v2069_v20 = vld [vmem:[#allocation2 + $0x60] ss:$8 sps:$4 sm:$0xff]   ;;  %v2207_v21 = vmov 2   ;;  %v2075_v25 = vld [vmem:[#allocation2 + $0x70] ss:$8 sps:$4 sm:$0xff]  }
 0x149   :  { %vm694_vm7 = vc.u32 %v2465_v22, %v2467_v23  ;;  %v693_v40 = vadd.s32 %v2467_v23, %v2465_v22  ;;  %v2074_v22 = vld [vmem:[%s2657_s3 + $0x74] ss:$8 sps:$4 sm:$0xff]   ;;  %v2072_v23 = vld [vmem:[%s2657_s3 + $0x70] ss:$8 sps:$4 sm:$0xff]  }
 0x14a   :  { %v696_v29 = vsel %vm694_vm7, %v695_v26, %v2468_v24  ;;  %v2077_v24 = vld [vmem:[#allocation2 + $0x74] ss:$8 sps:$4 sm:$0xff]   ;;  %v2208_v26 = vmov 3  }
 0x14b   :  { %v697_v30 = vadd.s32 %v696_v29, %v692_v28  ;;  %1231 = vmatpush1.bf16.msra.mxu1 %v2060_v15  ;;  %v2080_v28 = vld [vmem:[%s2657_s3 + $0x84] ss:$8 sps:$4 sm:$0xff]   ;;  %v2078_v29 = vld [vmem:[%s2657_s3 + $0x80] ss:$8 sps:$4 sm:$0xff]  }
 0x14c   :  { %1232 = vmatprep.subr.bf16.mxu1 %v2068_v17 }
 0x14d   :  { %v698_v31 = vadd.s32 536870912, %v697_v30 }
 0x14f   :  { %v699_v32 = vshrl.u32 %v698_v31, 30  ;;  %1233 = vmatpush1.bf16.msra.mxu1 %v2066_v19  ;;  %v2081_v31 = vld [vmem:[#allocation2 + $0x80] ss:$8 sps:$4 sm:$0xff]  }
 0x150   :  { %1234 = vmatprep.subr.bf16.mxu1 %v2074_v22 }
 0x151   :  { %v700_v33 = vshll.u32 %v699_v32, 30  ;;  %v723_v53 = vsub.s32 4, %v699_v32 }
 0x153   :  { %v701_v34 = vsub.s32 %v697_v30, %v700_v33  ;;  %v724_v56 = vsel %vm639_vm9, %v723_v53, %v699_v32  ;;  %1235 = vmatpush1.bf16.msra.mxu1 %v2072_v23  ;;  %v2083_v30 = vld [vmem:[#allocation2 + $0x84] ss:$8 sps:$4 sm:$0xff]   ;;  %v2209_v32 = vmov 4   ;;  %v2210_v33 = vmov 5   ;;  %v2110_v53 = vld [vmem:[%s2657_s3 + $0xd4] ss:$8 sps:$4 sm:$0xff]  }
 0x154   :  { %v726_v58 = vsel %vm638_vm10, 0, %v724_v56  ;;  %1236 = vmatprep.subr.bf16.mxu1 %v2080_v28  ;;  %v2111_v56 = vld [vmem:[#allocation2 + $0xd0] ss:$8 sps:$4 sm:$0xff]  }
 0x155   :  { %v703_v35 = vsub.s32 0, %v701_v34  ;;  %v833_v59 = vadd.s32 3, %v726_v58  ;;  %v730_v60 = vand.u32 3, %v726_v58  ;;  %v2119_v58 = vld [vmem:[#allocation2 + $0xe4] ss:$8 sps:$4 sm:$0xff]  }
 0x157   :  { %v1753_v36 = vmin.u32 %v703_v35, %v701_v34  ;;  %v834_v62 = vand.u32 3, %v833_v59  ;;  %vm735_vm11 = vcmp.eq.s32.totalorder %v730_v60, 2  ;;  %vm732_vm13 = vcmp.eq.s32.totalorder %v730_v60, 0  ;;  %v2089_v35 = vld [vmem:[#allocation2 + $0x94] ss:$8 sps:$4 sm:$0xff]   ;;  %1237 = vmatpush1.bf16.msra.mxu1 %v2078_v29 }
 0x158   :  { %vm731_vm15 = vcmp.lt.s32.totalorder %v730_v60, 2  ;;  %v2114_v59 = vld [vmem:[%s2657_s3 + $0xe0] ss:$8 sps:$4 sm:$0xff]  }
 0x159   :  { %v705_v37 = vclz %v1753_v36  ;;  %vm839_vm12 = vcmp.eq.s32.totalorder %v834_v62, 2  ;;  %vm836_vm14 = vcmp.eq.s32.totalorder %v834_v62, 0  ;;  %vm835_vm0 = vcmp.lt.s32.totalorder %v834_v62, 2  ;;  %v2084_v36 = vld [vmem:[%s2657_s3 + $0x90] ss:$8 sps:$4 sm:$0xff]  }
 0x15a   :  { %v2117_v60 = vld [vmem:[#allocation2 + $0xe0] ss:$8 sps:$4 sm:$0xff]   ;;  %v2122_v62 = vld [vmem:[%s2657_s3 + $0xf4] ss:$8 sps:$4 sm:$0xff]  }
 0x15b   :  { %v1754_v38 = vadd.s32 4294967294, %v705_v37  ;;  %v2087_v37 = vld [vmem:[#allocation2 + $0x90] ss:$8 sps:$4 sm:$0xff]  }
 0x15d   :  { %vm1755_vm8 = vcmp.lt.s32.totalorder %v1754_v38, 0 }
 0x15e   :  { %v708_v39 = vsel %vm1755_vm8, 0, %v1754_v38  ;;  %v2211_v38 = vmov 6  }
 0x15f   :  { %v709_v41 = vsub.s32 32, %v708_v39  ;;  %v713_v43 = vsub.s32 4294967266, %v708_v39  ;;  %v710_v44 = vshll.u32 %v701_v34, %v708_v39  ;;  %v2086_v34 = vld [vmem:[%s2657_s3 + $0x94] ss:$8 sps:$4 sm:$0xff]   ;;  %v2092_v39 = vld [vmem:[%s2657_s3 + $0xa4] ss:$8 sps:$4 sm:$0xff]  }
 0x160   :  { %1238 = vmatprep.subr.bf16.mxu1 %v2086_v34 }
 0x161   :  { %v711_v45 = vshrl.u32 %v693_v40, %v709_v41  ;;  %v714_v46 = vadd.s32 127, %v713_v43  ;;  %v2095_v40 = vld [vmem:[#allocation2 + $0xa4] ss:$8 sps:$4 sm:$0xff]   ;;  %1239 = vmatpush1.bf16.msra.mxu1 %v2084_v36  ;;  %v2090_v41 = vld [vmem:[%s2657_s3 + $0xa0] ss:$8 sps:$4 sm:$0xff]  }
 0x162   :  { %1240 = vmatprep.subr.bf16.mxu1 %v2092_v39  ;;  %v2093_v43 = vld [vmem:[#allocation2 + $0xa0] ss:$8 sps:$4 sm:$0xff]  }
 0x163   :  { %v712_v47 = vor.u32 %v711_v45, %v710_v44  ;;  %v715_v48 = vshll.u32 %v714_v46, 23  ;;  %v2098_v44 = vld [vmem:[%s2657_s3 + $0xb4] ss:$8 sps:$4 sm:$0xff]   ;;  %v2096_v46 = vld [vmem:[%s2657_s3 + $0xb0] ss:$8 sps:$4 sm:$0xff]  }
 0x164   :  { %v2101_v45 = vld [vmem:[#allocation2 + $0xb4] ss:$8 sps:$4 sm:$0xff]  }
 0x165   :  { %v716_v49 = vor.u32 4788187, %v715_v48  ;;  %v719_v51 = vcvt.s32.f32 %v712_v47  ;;  %1241 = vmatpush1.bf16.msra.mxu1 %v2090_v41  ;;  %v2099_v47 = vld [vmem:[#allocation2 + $0xb0] ss:$8 sps:$4 sm:$0xff]   ;;  %v2104_v48 = vld [vmem:[%s2657_s3 + $0xc4] ss:$8 sps:$4 sm:$0xff]  }
 0x166   :  { %1242 = vmatprep.subr.bf16.mxu1 %v2098_v44 }
 0x167   :  { %v717_v50 = vand.u32 2147483647, %v716_v49  ;;  %v2107_v49 = vld [vmem:[#allocation2 + $0xc4] ss:$8 sps:$4 sm:$0xff]  }
 0x169   :  { %v720_v52 = vmul.f32 %v719_v51, %v717_v50  ;;  %v2212_v50 = vmov 7   ;;  %1243 = vmatpush1.bf16.msra.mxu1 %v2096_v46  ;;  %v2102_v51 = vld [vmem:[%s2657_s3 + $0xc0] ss:$8 sps:$4 sm:$0xff]  }
 0x16a   :  { %1244 = vmatprep.subr.bf16.mxu1 %v2104_v48 }
 0x16b   :  { %v721_v54 = vxor.u32 2147483648, %v720_v52 }
 0x16d   :  { %v722_v55 = vsel %vm639_vm9, %v721_v54, %v720_v52  ;;  %v2105_v52 = vld [vmem:[#allocation2 + $0xc0] ss:$8 sps:$4 sm:$0xff]   ;;  %v2113_v54 = vld [vmem:[#allocation2 + $0xd4] ss:$8 sps:$4 sm:$0xff]   ;;  %1245 = vmatpush1.bf16.msra.mxu1 %v2102_v51 }
 0x16e   :  { %v725_v57 = vsel %vm638_vm10, %v2443_v27, %v722_v55  ;;  %v2059_v27 = vld [vmem:[#allocation2 + $0x44] ss:$8 sps:$4 sm:$0xff]   ;;  %v2108_v55 = vld [vmem:[%s2657_s3 + $0xd0] ss:$8 sps:$4 sm:$0xff]   ;;  %1246 = vmatprep.subr.bf16.mxu1 %v2110_v53 }
 0x16f   :  { %2142 = vcosq.f32 %v725_v57  ;;  %1463 = vmatprep.subr.bf16.mxu0 %v2059_v27 }
 0x170   :  { %2144 = vsinq.f32 %v725_v57  ;;  %1464 = vmatpush1.bf16.msra.mxu0 %v2057_v12  ;;  %v2116_v57 = vld [vmem:[%s2657_s3 + $0xe4] ss:$8 sps:$4 sm:$0xff]  }
 0x171   :  { %1465 = vmatprep.subr.bf16.mxu0 %v2065_v14  ;;  %1247 = vmatpush1.bf16.msra.mxu1 %v2108_v55 }
 0x172   :  { %1248 = vmatprep.subr.bf16.mxu1 %v2116_v57 }
 0x174   :  { %1466 = vmatpush1.bf16.msra.mxu0 %v2063_v16 }
 0x175   :  { %1467 = vmatprep.subr.bf16.mxu0 %v2071_v18  ;;  %1249 = vmatpush1.bf16.msra.mxu1 %v2114_v59 }
 0x176   :  { %1250 = vmatprep.subr.bf16.mxu1 %v2122_v62 }
 0x178   :  { %1468 = vmatpush1.bf16.msra.mxu0 %v2069_v20 }
 0x179   :  { %v2143_v63 = vpop.eup %2142  ;;  %1469 = vmatprep.subr.bf16.mxu0 %v2077_v24 }
 0x17a   :  { %v2145_v0 = vpop.eup %2144  ;;  %v736_v1 = vxor.u32 2147483648, %v2143_v63 }
 0x17b   :  { %v733_v2 = vxor.u32 2147483648, %v2145_v0 }
 0x17c   :  { %v737_v3 = vsel %vm735_vm11, %v736_v1, %v2145_v0  ;;  %v841_v42 = vsel %vm839_vm12, %v736_v1, %v2145_v0  ;;  %1470 = vmatpush1.bf16.msra.mxu0 %v2075_v25  ;;  %v2120_v0 = vld [vmem:[%s2657_s3 + $0xf0] ss:$8 sps:$4 sm:$0xff]  }
 0x17d   :  { %v734_v4 = vsel %vm732_vm13, %v2143_v63, %v733_v2  ;;  %v838_v5 = vsel %vm836_vm14, %v2143_v63, %v733_v2  ;;  %1471 = vmatprep.subr.bf16.mxu0 %v2083_v30  ;;  %v2125_v63 = vld [vmem:[#allocation2 + $0xf4] ss:$8 sps:$4 sm:$0xff]   ;;  %v2123_v1 = vld [vmem:[#allocation2 + $0xf0] ss:$8 sps:$4 sm:$0xff]   ;;  %1251 = vmatpush1.bf16.msra.mxu1 %v2120_v0  ;;  %v2126_v2 = vld [vmem:[%s2660_s6 + $0x40] sm:$0xff]  }
 0x17e   :  { %v738_v6 = vsel %vm731_vm15, %v734_v4, %v737_v3  ;;  %v842_v7 = vsel %vm835_vm0, %v838_v5, %v841_v42  ;;  %1909 = vmatprep.subr.bf16.mxu1 %v2126_v2  ;;  %v850_v5 = vlaneseq }
 0x17f   :  { %v2479_v8 = vsel %vm729_vm1, nan, %v738_v6  ;;  %v2481_v9 = vsel %vm729_vm1, nan, %v842_v7  ;;  %v844_v7 = vld [vmem:[%s2659_s5] sm:$0xff] }
 0x180   :  { %883 = vperm.xlu1 %1962, %v2479_v8   ;;  %862 = vperm.xlu0 %1961, %v2479_v8   ;;  %vm846_vm2 = vcmp.gt.f32.partialorder %v844_v7, 0.0 }
 0x181   :  { %1472 = vmatpush1.bf16.msra.mxu0 %v2081_v31  ;;  %v848_v13 = vsel %vm846_vm2, 1, %v2200_v61 }
 0x182   :  { %1473 = vmatprep.subr.bf16.mxu0 %v2089_v35 }
 0x184   :  { %887 = vperm.xlu1 %1962, %v2481_v9   ;;  %867 = vperm.xlu0 %1961, %v2481_v9  }
 0x185   :  { %1474 = vmatpush1.bf16.msra.mxu0 %v2087_v37 }
 0x186   :  { %1475 = vmatprep.subr.bf16.mxu0 %v2095_v40 }
 0x188   :  { %1964 = vset.pattern.permute.xlu1 %v2207_v21  ;;  %1963 = vset.pattern.permute.xlu0 %v2207_v21 }
 0x189   :  { %909 = vperm.xlu1 %1964, %v2481_v9   ;;  %905 = vperm.xlu0 %1963, %v2479_v8  }
 0x18a   :  { %1476 = vmatpush1.bf16.msra.mxu0 %v2093_v43 }
 0x18b   :  { %1477 = vmatprep.subr.bf16.mxu0 %v2101_v45 }
 0x18d   :  { %1965 = vset.pattern.permute.xlu1 %v2208_v26  ;;  %1966 = vset.pattern.permute.xlu0 %v2208_v26 }
 0x18e   :  { %927 = vperm.xlu1 %1965, %v2479_v8   ;;  %931 = vperm.xlu0 %1966, %v2481_v9  }
 0x18f   :  { %1478 = vmatpush1.bf16.msra.mxu0 %v2099_v47 }
 0x190   :  { %1479 = vmatprep.subr.bf16.mxu0 %v2107_v49 }
 0x192   :  { %1967 = vset.pattern.permute.xlu1 %v2209_v32  ;;  %1968 = vset.pattern.permute.xlu0 %v2210_v33 }
 0x193   :  { %949 = vperm.xlu1 %1967, %v2479_v8   ;;  %971 = vperm.xlu0 %1968, %v2479_v8  }
 0x194   :  { %1480 = vmatpush1.bf16.msra.mxu0 %v2105_v52 }
 0x195   :  { %1481 = vmatprep.subr.bf16.mxu0 %v2113_v54 }
 0x197   :  { %953 = vperm.xlu1 %1967, %v2481_v9   ;;  %1971 = vset.pattern.permute.xlu0 %v2211_v38 }
 0x198   :  { %997 = vperm.xlu0 %1971, %v2481_v9   ;;  %1482 = vmatpush1.bf16.msra.mxu0 %v2111_v56 }
 0x199   :  { %1483 = vmatprep.subr.bf16.mxu0 %v2119_v58 }
 0x19b   :  { %1969 = vset.pattern.permute.xlu1 %v2210_v33 }
 0x19c   :  { %975 = vperm.xlu1 %1969, %v2481_v9   ;;  %1973 = vset.pattern.permute.xlu0 %v2212_v50 }
 0x19d   :  { %1484 = vmatpush1.bf16.msra.mxu0 %v2117_v60 }
 0x19e   :  { %1485 = vmatprep.subr.bf16.mxu0 %v2125_v63 }
 0x1a0   :  { %1970 = vset.pattern.permute.xlu1 %v2211_v38 }
 0x1a1   :  { %993 = vperm.xlu1 %1970, %v2479_v8   ;;  %1486 = vmatpush1.bf16.msra.mxu0 %v2123_v1 }
 0x1a5   :  { %1972 = vset.pattern.permute.xlu1 %v2212_v50 }
 0x1a6   :  { %1015 = vperm.xlu1 %1972, %v2479_v8   ;;  %v845_v8 = vld [vmem:[%s2659_s5 + $0x8] sm:$0xff] }
 0x1a7   :  { %vm847_vm3 = vcmp.gt.f32.partialorder %v845_v8, 0.0 }
 0x1a8   :  { %v849_v14 = vsel %vm847_vm3, 1, %v2200_v61 }
 0x1aa   :  { %1019 = vperm.xlu1 %1972, %v2481_v9   ;;  %v2580_v9 = vshrl.u32 %v850_v5, 7 }
 0x1ac   :  { %v874_v12 = vsub.s32 1, %v2580_v9  ;;  %v852_v27 = vsub.s32 0, %v2580_v9  ;;  %v896_v16 = vsub.s32 2, %v2580_v9  ;;  %v918_v18 = vsub.s32 3, %v2580_v9 }
 0x1ad   :  { %v940_v23 = vsub.s32 4, %v2580_v9  ;;  %v962_v31 = vsub.s32 5, %v2580_v9  ;;  %v984_v32 = vsub.s32 6, %v2580_v9  ;;  %v1006_v49 = vsub.s32 7, %v2580_v9 }
 0x1ae   :  { %v875_v19 = vrot.slane %v848_v13, %v874_v12  ;;  %v879_v20 = vrot.slane %v849_v14, %v874_v12  ;;  %v853_v21 = vrot.slane %v848_v13, %v852_v27  ;;  %v857_v22 = vrot.slane %v849_v14, %v852_v27 }
 0x1af   :  { %v897_v25 = vrot.slane %v848_v13, %v896_v16  ;;  %v901_v26 = vrot.slane %v849_v14, %v896_v16  ;;  %v919_v28 = vrot.slane %v848_v13, %v918_v18  ;;  %v923_v61 = vrot.slane %v849_v14, %v918_v18  ;;  %v2128_v16 = vld [vmem:[%s2660_s6 + $0x48] sm:$0xff]   ;;  %v2130_v18 = vld [vmem:[%s2660_s6 + $0x50] sm:$0xff]  }
 0x1b0   :  { %vm880_vm4 = vcmp.eq.s32.totalorder %v875_v19, 1  ;;  %vm881_vm5 = vcmp.eq.s32.totalorder %v879_v20, 1  ;;  %vm858_vm6 = vcmp.eq.s32.totalorder %v853_v21, 1  ;;  %vm859_vm7 = vcmp.eq.s32.totalorder %v857_v22, 1  ;;  %v2131_v19 = vld [vmem:[%s2660_s6 + $0x10] sm:$0xff]   ;;  %v2132_v20 = vld [vmem:[%s2660_s6 + $0x58] sm:$0xff]  }
 0x1b1   :  { %v941_v30 = vrot.slane %v848_v13, %v940_v23  ;;  %vm902_vm8 = vcmp.eq.s32.totalorder %v897_v25, 1  ;;  %vm903_vm9 = vcmp.eq.s32.totalorder %v901_v26, 1  ;;  %vm924_vm10 = vcmp.eq.s32.totalorder %v919_v28, 1  ;;  %v2133_v21 = vld [vmem:[%s2660_s6 + $0x18] sm:$0xff]   ;;  %v2134_v22 = vld [vmem:[%s2660_s6 + $0x60] sm:$0xff]   ;;  %v2137_v25 = vld [vmem:[%s2660_s6 + $0x28] sm:$0xff]  }
 0x1b2   :  { %v945_v33 = vrot.slane %v849_v14, %v940_v23  ;;  %vm925_vm11 = vcmp.eq.s32.totalorder %v923_v61, 1  ;;  %v963_v39 = vrot.slane %v848_v13, %v962_v31  ;;  %v967_v40 = vrot.slane %v849_v14, %v962_v31  ;;  %v2135_v23 = vld [vmem:[%s2660_s6 + $0x20] sm:$0xff]   ;;  %v2138_v26 = vld [vmem:[%s2660_s6 + $0x70] sm:$0xff]   ;;  %v2140_v61 = vld [vmem:[%s2660_s6 + $0x78] sm:$0xff]  }
 0x1b3   :  { %vm946_vm12 = vcmp.eq.s32.totalorder %v941_v30, 1  ;;  %v985_v44 = vrot.slane %v848_v13, %v984_v32  ;;  %v989_v45 = vrot.slane %v849_v14, %v984_v32  ;;  %v1007_v59 = vrot.slane %v848_v13, %v1006_v49  ;;  %v2139_v28 = vld [vmem:[%s2660_s6 + $0x30] sm:$0xff]  }
 0x1b4   :  { %vm947_vm13 = vcmp.eq.s32.totalorder %v945_v33, 1  ;;  %vm968_vm14 = vcmp.eq.s32.totalorder %v963_v39, 1  ;;  %vm969_vm15 = vcmp.eq.s32.totalorder %v967_v40, 1  ;;  %v1011_v60 = vrot.slane %v849_v14, %v1006_v49 }
 0x1b5   :  { %vm990_vm0 = vcmp.eq.s32.totalorder %v985_v44, 1  ;;  %vm991_vm1 = vcmp.eq.s32.totalorder %v989_v45, 1  ;;  %vm1012_vm2 = vcmp.eq.s32.totalorder %v1007_v59, 1 }
 0x1b6   :  { %vm1013_vm3 = vcmp.eq.s32.totalorder %v1011_v60, 1 }
 0x1ff   :  { %v884_v3 = vpop.permute.xlu1 %883  ;;  %v863_v4 = vpop.permute.xlu0 %862 }
 0x203   :  { %v888_v42 = vpop.permute.xlu1 %887  ;;  %v868_v10 = vpop.permute.xlu0 %867 }
 0x204   :  { %v890_v35 = vsel %vm880_vm4, %v884_v3, %v888_v42  ;;  %v891_v36 = vsel %vm881_vm5, %v884_v3, %v888_v42  ;;  %v870_v37 = vsel %vm858_vm6, %v863_v4, %v868_v10  ;;  %v871_v38 = vsel %vm859_vm7, %v863_v4, %v868_v10 }
 0x205   :  { %v892_v46 = vmul.f32 %v890_v35, %v870_v37  ;;  %v893_v47 = vmul.f32 %v891_v36, %v871_v38 }
 0x208   :  { %v910_v6 = vpop.permute.xlu1 %909  ;;  %v906_v17 = vpop.permute.xlu0 %905 }
 0x209   :  { %v912_v41 = vsel %vm902_vm8, %v906_v17, %v910_v6  ;;  %v913_v43 = vsel %vm903_vm9, %v906_v17, %v910_v6  ;;  %v2129_v17 = vld [vmem:[%s2660_s6 + $0x8] sm:$0xff]  }
 0x20a   :  { %v914_v53 = vmul.f32 %v912_v41, %v892_v46  ;;  %v915_v54 = vmul.f32 %v913_v43, %v893_v47 }
 0x20d   :  { %v928_v11 = vpop.permute.xlu1 %927  ;;  %v932_v29 = vpop.permute.xlu0 %931 }
 0x20e   :  { %v934_v50 = vsel %vm924_vm10, %v928_v11, %v932_v29  ;;  %v935_v51 = vsel %vm925_vm11, %v928_v11, %v932_v29  ;;  %v2141_v29 = vld [vmem:[%s2660_s6 + $0x38] sm:$0xff]  }
 0x20f   :  { %v936_v57 = vmul.f32 %v934_v50, %v914_v53  ;;  %v937_v58 = vmul.f32 %v935_v51, %v915_v54 }
 0x212   :  { %v950_v15 = vpop.permute.xlu1 %949  ;;  %v972_v48 = vpop.permute.xlu0 %971 }
 0x216   :  { %v954_v24 = vpop.permute.xlu1 %953 }
 0x217   :  { %v956_v55 = vsel %vm946_vm12, %v950_v15, %v954_v24  ;;  %v957_v56 = vsel %vm947_vm13, %v950_v15, %v954_v24  ;;  %v998_v2 = vpop.permute.xlu0 %997  ;;  %v2127_v15 = vld [vmem:[%s2660_s6] sm:$0xff]   ;;  %v2136_v24 = vld [vmem:[%s2660_s6 + $0x68] sm:$0xff]  }
 0x218   :  { %v958_v0 = vmul.f32 %v956_v55, %v936_v57  ;;  %v959_v1 = vmul.f32 %v957_v56, %v937_v58 }
 0x21b   :  { %v976_v34 = vpop.permute.xlu1 %975 }
 0x21c   :  { %v978_v62 = vsel %vm968_vm14, %v972_v48, %v976_v34  ;;  %v979_v63 = vsel %vm969_vm15, %v972_v48, %v976_v34  ;;  %v1824_v48 = vld [vmem:[%s2661_s7] ss:$0 sm:$0xff] }
 0x21d   :  { %v980_v5 = vmul.f32 %v978_v62, %v958_v0  ;;  %v981_v6 = vmul.f32 %v979_v63, %v959_v1 }
 0x220   :  { %v994_v52 = vpop.permute.xlu1 %993 }
 0x221   :  { %v1000_v42 = vsel %vm990_vm0, %v994_v52, %v998_v2  ;;  %v1001_v4 = vsel %vm991_vm1, %v994_v52, %v998_v2 }
 0x222   :  { %v1002_v7 = vmul.f32 %v1000_v42, %v980_v5  ;;  %v1003_v8 = vmul.f32 %v1001_v4, %v981_v6 }
 0x225   :  { %v1016_v3 = vpop.permute.xlu1 %1015 }
 0x229   :  { %v1020_v9 = vpop.permute.xlu1 %1019 }
 0x22a   :  { %v1022_v10 = vsel %vm1012_vm2, %v1016_v3, %v1020_v9  ;;  %v1023_v11 = vsel %vm1013_vm3, %v1016_v3, %v1020_v9 }
 0x22b   :  { %v1024_v12 = vmul.f32 %v1022_v10, %v1002_v7  ;;  %v1025_v27 = vmul.f32 %v1023_v11, %v1003_v8 }
 0x22d   :  { %v1026_v13 = vpack.c.bf16 %v1024_v12, %v1024_v12  ;;  %v1027_v14 = vpack.c.bf16 %v1025_v27, %v1025_v27 }
 0x22f   :  { %1252 = vmatprep.mubr.bf16.mxu1 %v1027_v14  ;;  %1487 = vmatprep.mubr.bf16.mxu0 %v1027_v14 }
 0x230   :  { %1253 = vmatmul.mubr.bf16.vlgmr.msra.gmra.mrb[8].mxu1 %v1026_v13  ;;  %1488 = vmatmul.mubr.bf16.vlgmr.msra.gmra.mrb[8].mxu0 %v1026_v13 }
 0x231   :  { %1910 = vmatpush3.bf16.msra.mxu1 %v2127_v15 }
 0x232   :  { %1911 = vmatprep.subr.bf16.mxu1 %v2128_v16 }
 0x235   :  { %1912 = vmatpush3.bf16.msra.mxu1 %v2129_v17 }
 0x236   :  { %1913 = vmatprep.subr.bf16.mxu1 %v2130_v18 }
 0x239   :  { %1914 = vmatpush3.bf16.msra.mxu1 %v2131_v19 }
 0x23a   :  { %1915 = vmatprep.subr.bf16.mxu1 %v2132_v20 }
 0x23d   :  { %1916 = vmatpush3.bf16.msra.mxu1 %v2133_v21 }
 0x23e   :  { %1917 = vmatprep.subr.bf16.mxu1 %v2134_v22 }
 0x241   :  { %1918 = vmatpush3.bf16.msra.mxu1 %v2135_v23 }
 0x242   :  { %1919 = vmatprep.subr.bf16.mxu1 %v2136_v24 }
 0x245   :  { %1920 = vmatpush3.bf16.msra.mxu1 %v2137_v25 }
 0x246   :  { %1921 = vmatprep.subr.bf16.mxu1 %v2138_v26 }
 0x249   :  { %1922 = vmatpush3.bf16.msra.mxu1 %v2139_v28 }
 0x24a   :  { %1923 = vmatprep.subr.bf16.mxu1 %v2140_v61 }
 0x24d   :  { %1924 = vmatpush3.bf16.msra.mxu1 %v2141_v29 }
 0x303   :  { %v1254_v30 = vpop.f32.mrb[8].mxu1  ;;  %v1489_v31 = vpop.f32.mrb[8].mxu0 }
 0x304   :  { %v1261_v32 = vmul.f32 %v1254_v30, %v1254_v30  ;;  %v1496_v33 = vmul.f32 %v1489_v31, %v1489_v31  ;;  %v1256_v34 = vpop.f32.mrb[9].mxu1  ;;  %v1491_v35 = vpop.f32.mrb[9].mxu0 }
 0x305   :  { %v1262_v36 = vmul.f32 %v1256_v34, %v1256_v34  ;;  %v1497_v37 = vmul.f32 %v1491_v35, %v1491_v35  ;;  %v1258_v38 = vpop.f32.mrb[10].mxu1  ;;  %v1493_v39 = vpop.f32.mrb[10].mxu0 }
 0x306   :  { %v1498_v40 = vadd.f32 %v1496_v33, %v1261_v32  ;;  %v1259_v41 = vpop.f32.mrb[11].mxu1  ;;  %v1494_v43 = vpop.f32.mrb[11].mxu0 }
 0x307   :  { %v1499_v44 = vadd.f32 %v1497_v37, %v1262_v36 }
 0x308   :  { %v1500_v46 = vpack.c.bf16 %v1498_v40, %v1498_v40 }
 0x309   :  { %v1501_v45 = vpack.c.bf16 %v1499_v44, %v1499_v44 }
 0x30b   :  { %1669 = vmatprep.mubr.bf16.mxu1 %v1501_v45 }
 0x30c   :  { %1670 = vmatmul.mubr.bf16.vlgmr.msra.gmra.mrb[12].mxu1 %v1500_v46 }
 0x3df   :  { %v1925_v47 = vpop.f32.mrb[12].mxu1 }
 0x3e0   :  { %v1926_v49 = vpop.f32.mrb[13].mxu1 }
 0x3e1   :  { %v1927_v50 = vadd.f32 %v1926_v49, %v1925_v47  ;;  %v1928_v51 = vpop.f32.mrb[14].mxu1 }
 0x3e2   :  { %v1929_v52 = vpop.f32.mrb[15].mxu1 }
 0x3e3   :  { %v1672_v53 = vadd.f32 %v1927_v50, %v1824_v48 }
 0x3e5   :  { %v1677_v54 = vpack.c.bf16 %v1672_v53, %v1672_v53 }
 0x3e7   :  { %1678 = vst [vmem:[#allocation5] sm:$0xf] %v1677_v54 }
 0x3e8   :  { %2179 = shalt.err (!%p2176_p12)
}
 0x3e9   :  { %s2180_s7 = scalar_lea.hbm %s2662_s8, 64 }
 0x3ea   :  { %p2181_p13 = scmp.ne.s32.totalorder %s2662_s8, %s2180_s7  ;;  %p2184_p0 = scmp.lt.u32.totalorder %s2180_s7, %s2662_s8 }
 0x3ec   :  { %p2186_p1 = pnand %p2184_p0, %p2181_p13 }
 0x3ee   :  { %2189 = shalt.err (!%p2186_p1)
}
 0x3ef   :  { %1688 = dma.vmem_to_hbm [thread:$0]  %s1686_s28, 64, %s2662_s8, [#allocation4]  }
 0x3f0   :  { %2192 = dma.done.wait [#allocation4], 64  }
 0x3f1   :  { %2193 = vsyncadd [#allocation4], 4294967232 }
 0x3f2   :  { %1692 = vsyncpa [#allocation3], 1 }
 0x3f3   :  { %1693 = vsyncpa [#allocation4], 1 }

</bundles_post_ra>
